<compile_context>
chip_gen: v6e
topology: v6e:2x2x1
jax: 0.10.0
libtpu: 0.0.40
codegen_flags: <defaults>
</compile_context>

<pallas_src>
import functools
import math

import numpy as np
import jax
import jax.numpy as jnp
from jax.experimental import pallas as pl
from jax.experimental.pallas import tpu as pltpu


# ----------------------------------------------------------------------------
# Kernels
# ----------------------------------------------------------------------------
def _ff_compute(x_ref, w1_ref, b1_ref, w2_ref, b2_ref, *, hidden_chunk, n_chunks):
    """Both matmuls fused; hidden dim processed in MXU-sized static chunks."""
    x = x_ref[...].astype(jnp.bfloat16)                        # (tm, dim) bf16 MXU operand
    tm = x.shape[0]
    dim = w2_ref.shape[1]
    acc = jnp.zeros((tm, dim), jnp.float32)
    for c in range(n_chunks):                                  # static, unrolled
        lo = c * hidden_chunk
        hi = lo + hidden_chunk
        # (tm, dim) @ (dim, hk) -> f32 accumulate on MXU
        h = jnp.dot(x, w1_ref[:, lo:hi], preferred_element_type=jnp.float32)
        h = h + b1_ref[:, lo:hi]                               # bias add in f32
        # TODO(synk): nn.Dropout is identity in eval mode; training-mode dropout
        # (pltpu.prng_seed / prng_random_bits) not implemented.
        # (tm, hk) @ (hk, dim) -> f32 accumulate
        acc = acc + jnp.dot(h.astype(jnp.bfloat16), w2_ref[lo:hi, :],
                            preferred_element_type=jnp.float32)
    return acc + b2_ref[...]


def _ff_kernel(x_ref, w1_ref, b1_ref, w2_ref, b2_ref, o_ref, *,
               hidden_chunk, n_chunks):
    y = _ff_compute(x_ref, w1_ref, b1_ref, w2_ref, b2_ref,
                    hidden_chunk=hidden_chunk, n_chunks=n_chunks)
    o_ref[...] = y.astype(o_ref.dtype)


def _ff_kernel_residual(x_ref, id_ref, w1_ref, b1_ref, w2_ref, b2_ref, o_ref, *,
                        hidden_chunk, n_chunks):
    y = _ff_compute(x_ref, w1_ref, b1_ref, w2_ref, b2_ref,
                    hidden_chunk=hidden_chunk, n_chunks=n_chunks)
    y = y + id_ref[...]                                        # residual in f32
    o_ref[...] = y.astype(o_ref.dtype)


# ----------------------------------------------------------------------------
# Wrapper
# ----------------------------------------------------------------------------
def _round_up(x, m):
    return ((x + m - 1) // m) * m


def feed_forward(x, params, identity=None, *, block_rows=256):
    """Fused FeedForward forward pass. x: (..., dim); identity: same shape or None."""
    orig_shape = x.shape
    dim = orig_shape[-1]
    rows = int(np.prod(orig_shape[:-1]))
    hidden = params["W1"].shape[1]
    assert params["W1"].shape == (dim, hidden)
    assert params["W2"].shape == (hidden, dim)

    x2 = x.reshape(rows, dim)                                  # keep input dtype; cast in-kernel
    id2 = None
    if identity is not None:
        assert identity.shape == orig_shape
        id2 = identity.reshape(rows, dim).astype(jnp.float32)

    # Weights feed the MXU natively in bf16; biases stay f32.
    w1 = params["W1"].astype(jnp.bfloat16)
    w2 = params["W2"].astype(jnp.bfloat16)
    b1 = params["b1"].astype(jnp.float32)
    b2 = params["b2"].astype(jnp.float32)

    # Hidden chunking: 512/256 match the 256x256 MXU (v6e/v7x); 128 for v5e;
    # a single chunk when hidden is small / indivisible.
    hidden_chunk = hidden
    for cand in (512, 256, 128):
        if hidden % cand == 0:
            hidden_chunk = cand
            break
    n_chunks = hidden // hidden_chunk

    # Row tile: multiple of 8 sublanes. NO wrapper-side padding — grid uses cdiv,
    # Pallas masks the partial last tile (garbage rows are never written back).
    tm = min(block_rows, _round_up(rows, 8))

    x_itemsize = jnp.dtype(x2.dtype).itemsize

    def vmem_estimate(t):
        weights = 2 * dim * hidden * 2                          # bf16 W1 + W2
        biases = (hidden + dim) * 4
        tiles = t * dim * (x_itemsize + 4 + (4 if id2 is not None else 0))
        scratch = t * hidden_chunk * 4 * 2 + t * dim * 4        # h chunk + f32 acc
        return 2 * (weights + biases + tiles) + scratch         # x2: default double-buffering

    budget = 40 * 1024 * 1024                                   # conservative for v7x 64 MiB/TC
    while tm > 8 and vmem_estimate(tm) > budget:
        tm = max(8, ((tm // 2) + 7) // 8 * 8)

    grid = (pl.cdiv(rows, tm),)

    row_spec = pl.BlockSpec((tm, dim), lambda i: (i, 0))
    w1_spec = pl.BlockSpec((dim, hidden), lambda i: (0, 0))     # resident across grid
    b1_spec = pl.BlockSpec((1, hidden), lambda i: (0, 0))
    w2_spec = pl.BlockSpec((hidden, dim), lambda i: (0, 0))
    b2_spec = pl.BlockSpec((1, dim), lambda i: (0, 0))

    if id2 is None:
        kernel = functools.partial(_ff_kernel,
                                   hidden_chunk=hidden_chunk, n_chunks=n_chunks)
        in_specs = [row_spec, w1_spec, b1_spec, w2_spec, b2_spec]
        args = (x2, w1, b1, w2, b2)
    else:
        kernel = functools.partial(_ff_kernel_residual,
                                   hidden_chunk=hidden_chunk, n_chunks=n_chunks)
        in_specs = [row_spec, row_spec, w1_spec, b1_spec, w2_spec, b2_spec]
        args = (x2, id2, w1, b1, w2, b2)

    flops = 2 * rows * dim * hidden * 2                         # two matmuls
    bytes_accessed = (rows * dim * (x_itemsize + 4 + (4 if id2 is not None else 0))
                      + 2 * dim * hidden * 2 + (hidden + dim) * 4)
    cost = pl.CostEstimate(flops=flops, transcendentals=0,
                           bytes_accessed=bytes_accessed)

    vmem_limit = int(min(max(vmem_estimate(tm) + (4 << 20), 16 << 20), 64 << 20))

    out = pl.pallas_call(
        kernel,
        out_shape=jax.ShapeDtypeStruct((rows, dim), jnp.float32),
        grid_spec=pltpu.PrefetchScalarGridSpec(
            num_scalar_prefetch=0,
            grid=grid,
            in_specs=in_specs,
            out_specs=pl.BlockSpec((tm, dim), lambda i: (i, 0)),
        ),
        compiler_params=pltpu.CompilerParams(
            dimension_semantics=("parallel",),                  # v7x: shard row tiles across TCs
            vmem_limit_bytes=vmem_limit,
        ),
        cost_estimate=cost,
    )(*args)

    return out.reshape(orig_shape)


# ----------------------------------------------------------------------------
# Deterministic parameter init (shapes match nn.Linear: W stored as (in, out)).
# ----------------------------------------------------------------------------
def init_params(key, dim, widening_factor):
    hidden = dim * widening_factor
    k1, k2, k3, k4 = jax.random.split(key, 4)

    def kaiming_uniform(k, fan_in, shape):
        bound = math.sqrt(1.0 / fan_in)
        return jax.random.uniform(k, shape, jnp.float32, -bound, bound)

    W1 = kaiming_uniform(k1, dim, (dim, hidden))
    b1 = kaiming_uniform(k2, dim, (1, hidden))
    W2 = kaiming_uniform(k3, hidden, (hidden, dim))
    b2 = kaiming_uniform(k4, hidden, (1, dim))
    return dict(W1=W1, b1=b1, W2=W2, b2=b2)


# ----------------------------------------------------------------------------
# Pure-JAX reference with matching numerics (bf16 matmul inputs, f32 accumulate)
# ----------------------------------------------------------------------------
def reference_forward(x, params, identity=None):
    bf = jnp.bfloat16
    h = jnp.dot(x.astype(bf), params["W1"].astype(bf),
                preferred_element_type=jnp.float32) + params["b1"][0]
    y = jnp.dot(h.astype(bf), params["W2"].astype(bf),
                preferred_element_type=jnp.float32) + params["b2"][0]
    if identity is not None:
        y = y + identity
    return y


# ----------------------------------------------------------------------------
if __name__ == "__main__":
    bs, seq, dim = 2, 8, 32
    widening_factor = 4

    key = jax.random.PRNGKey(0)
    kx, ki, kp = jax.random.split(key, 3)
    x = jax.random.normal(kx, (bs, seq, dim), jnp.float32)
    identity = jax.random.normal(ki, (bs, seq, dim), jnp.float32)
    params = init_params(kp, dim, widening_factor)

    # No residual
    out = jax.block_until_ready(feed_forward(x, params, identity=None))
    ref = reference_forward(x, params, identity=None)
    np.testing.assert_allclose(np.asarray(out), np.asarray(ref),
                               atol=2e-2, rtol=2e-2)

    # With residual
    out_r = jax.block_until_ready(feed_forward(x, params, identity=identity))
    ref_r = reference_forward(x, params, identity=identity)
    np.testing.assert_allclose(np.asarray(out_r), np.asarray(ref_r),
                               atol=2e-2, rtol=2e-2)

    print("KERNEL_OK")
</pallas_src>

<mosaic_0001>
module attributes {stable_mosaic.version = 11 : i64} {
  func.func @_ff_kernel(%arg0: i32, %arg1: memref<16x32xf32, #tpu.memory_space<vmem>>, %arg2: memref<32x128xbf16, #tpu.memory_space<vmem>>, %arg3: memref<1x128xf32, #tpu.memory_space<vmem>>, %arg4: memref<128x32xbf16, #tpu.memory_space<vmem>>, %arg5: memref<1x32xf32, #tpu.memory_space<vmem>>, %arg6: memref<16x32xf32, #tpu.memory_space<vmem>>) attributes {dimension_semantics = [#tpu.dimension_semantics<parallel>], iteration_bounds = array<i64: 1>, scalar_prefetch = 0 : i64, scratch_operands = 0 : i64, tpu.core_type = #tpu.core_type<tc>, window_params = [{transform_indices = @transform_0, window_bounds = array<i64: 16, 32>}, {pipeline_mode = #tpu.pipeline_mode<synchronous>, transform_indices = @transform_1, window_bounds = array<i64: 32, 128>}, {pipeline_mode = #tpu.pipeline_mode<synchronous>, transform_indices = @transform_2, window_bounds = array<i64: 1, 128>}, {pipeline_mode = #tpu.pipeline_mode<synchronous>, transform_indices = @transform_3, window_bounds = array<i64: 128, 32>}, {pipeline_mode = #tpu.pipeline_mode<synchronous>, transform_indices = @transform_4, window_bounds = array<i64: 1, 32>}, {transform_indices = @transform_5, window_bounds = array<i64: 16, 32>}]} {
    %c0 = arith.constant 0 : index
    %c0_0 = arith.constant 0 : index
    %0 = vector.load %arg1[%c0, %c0_0] : memref<16x32xf32, #tpu.memory_space<vmem>>, vector<16x32xf32>
    %1 = arith.truncf %0 : vector<16x32xf32> to vector<16x32xbf16>
    %cst = arith.constant 0.000000e+00 : f32
    %2 = vector.broadcast %cst : f32 to vector<16x32xf32>
    %c0_1 = arith.constant 0 : index
    %c0_2 = arith.constant 0 : index
    %3 = vector.load %arg2[%c0_1, %c0_2] : memref<32x128xbf16, #tpu.memory_space<vmem>>, vector<32x128xbf16>
    %cst_3 = arith.constant dense<0.000000e+00> : vector<16x128xf32>
    %4 = tpu.matmul %1, %3, %cst_3 {dimension_numbers = #tpu.dot_dimension_numbers<[1], [0], [0], [1], [0, 0, 1, 1], [], []>} : vector<16x32xbf16>, vector<32x128xbf16>, vector<16x128xf32> -> vector<16x128xf32>
    %c0_4 = arith.constant 0 : index
    %c0_5 = arith.constant 0 : index
    %5 = vector.load %arg3[%c0_4, %c0_5] : memref<1x128xf32, #tpu.memory_space<vmem>>, vector<1x128xf32>
    %6 = vector.broadcast %5 : vector<1x128xf32> to vector<16x128xf32>
    %7 = arith.addf %4, %6 : vector<16x128xf32>
    %8 = arith.truncf %7 : vector<16x128xf32> to vector<16x128xbf16>
    %c0_6 = arith.constant 0 : index
    %c0_7 = arith.constant 0 : index
    %9 = vector.load %arg4[%c0_6, %c0_7] : memref<128x32xbf16, #tpu.memory_space<vmem>>, vector<128x32xbf16>
    %cst_8 = arith.constant dense<0.000000e+00> : vector<16x32xf32>
    %10 = tpu.matmul %8, %9, %cst_8 {dimension_numbers = #tpu.dot_dimension_numbers<[1], [0], [0], [1], [0, 0, 1, 1], [], []>} : vector<16x128xbf16>, vector<128x32xbf16>, vector<16x32xf32> -> vector<16x32xf32>
    %11 = arith.addf %2, %10 : vector<16x32xf32>
    %c0_9 = arith.constant 0 : index
    %c0_10 = arith.constant 0 : index
    %12 = vector.load %arg5[%c0_9, %c0_10] : memref<1x32xf32, #tpu.memory_space<vmem>>, vector<1x32xf32>
    %13 = vector.broadcast %12 : vector<1x32xf32> to vector<16x32xf32>
    %14 = arith.addf %11, %13 : vector<16x32xf32>
    %c0_11 = arith.constant 0 : index
    %c0_12 = arith.constant 0 : index
    %15 = vector.load %arg6[%c0_11, %c0_12] : memref<16x32xf32, #tpu.memory_space<vmem>>, vector<16x32xf32>
    tpu.vector_store %arg6[%c0_11, %c0_12], %14 {strides = array<i32>} : memref<16x32xf32, #tpu.memory_space<vmem>>, vector<16x32xf32>,
    return
  }
  func.func @transform_0(%arg0: i32) -> (i32, i32) {
    %c0_i32 = arith.constant 0 : i32
    %c0_i32_0 = arith.constant 0 : i32
    return %arg0, %c0_i32 : i32, i32
  }
  func.func @transform_1(%arg0: i32) -> (i32, i32) {
    %c0_i32 = arith.constant 0 : i32
    %c0_i32_0 = arith.constant 0 : i32
    %c0_i32_1 = arith.constant 0 : i32
    return %c0_i32, %c0_i32_0 : i32, i32
  }
  func.func @transform_2(%arg0: i32) -> (i32, i32) {
    %c0_i32 = arith.constant 0 : i32
    %c0_i32_0 = arith.constant 0 : i32
    %c0_i32_1 = arith.constant 0 : i32
    return %c0_i32, %c0_i32_0 : i32, i32
  }
  func.func @transform_3(%arg0: i32) -> (i32, i32) {
    %c0_i32 = arith.constant 0 : i32
    %c0_i32_0 = arith.constant 0 : i32
    %c0_i32_1 = arith.constant 0 : i32
    return %c0_i32, %c0_i32_0 : i32, i32
  }
  func.func @transform_4(%arg0: i32) -> (i32, i32) {
    %c0_i32 = arith.constant 0 : i32
    %c0_i32_0 = arith.constant 0 : i32
    %c0_i32_1 = arith.constant 0 : i32
    return %c0_i32, %c0_i32_0 : i32, i32
  }
  func.func @transform_5(%arg0: i32) -> (i32, i32) {
    %c0_i32 = arith.constant 0 : i32
    %c0_i32_0 = arith.constant 0 : i32
    return %arg0, %c0_i32 : i32, i32
  }
}

</mosaic_0001>

<bundles_post_ra>
// kernel: tpu_custom_call.1
= control target key start
LH: loop header
LB: loop body
LE: loop exit
PB: predicated region body
PF: predicated region fallthrough
CT: control target
= control target key end

     0   :  { %v314_v1 = vmov 0.0   ;;  %vm315_vm0 = vmmov 0   ;;  %vm48_vm1 = vcmask 261120   ;;  %s397_s0 = inlined_call_operand.vmem [shape: f32[16,32], index: 0, kind: input, shape index: {}]   ;;  %s398_s1 = inlined_call_operand.vmem [shape: bf16[32,128], index: 1, kind: input, shape index: {}]   ;;  %s399_s2 = inlined_call_operand.vmem [shape: f32[1,128], index: 2, kind: input, shape index: {}]   ;;  %s400_s3 = inlined_call_operand.vmem [shape: bf16[128,32], index: 3, kind: input, shape index: {}]   ;;  %s401_s4 = inlined_call_operand.vmem [shape: f32[1,32], index: 4, kind: input, shape index: {}]   ;;  %s402_s5 = inlined_call_operand.hbm [shape: f32[16,32], index: 5, kind: output, shape index: {}]  }
   0x1   :  { %v282_v0 = vld [vmem:[%s398_s1 + $0x8] sm:$0xff]   ;;  %249 = vmatprep.subr.bf16.mxu0 %v314_v1  ;;  %v283_v2 = vld [vmem:[%s398_s1] sm:$0xff]   ;;  %257 = vmatprep.subr.bf16.mxu1 %v314_v1  ;;  %v284_v5 = vld [vmem:[%s400_s3 + $0x38] sm:$0xff]  }
   0x2   :  { %250 = vmatpush3.bf16.msra.mxu0 %v282_v0  ;;  %253 = vmatprep.mubr.msk.bf16.mxu0 %vm315_vm0, %v314_v1  ;;  %v22_v3 = vld [vmem:[%s397_s0] sm:$0xff]  ;;  %v23_v4 = vld [vmem:[%s397_s0 + $0x8] sm:$0xff]  ;;  %v285_v7 = vld [vmem:[%s400_s3 + $0x30] sm:$0xff]  }
   0x3   :  { %251 = vmatprep.subr.bf16.mxu0 %v314_v1  ;;  %273 = vmatprep.mubr.msk.bf16.mxu1 %vm315_vm0, %v314_v1  ;;  %v24_v6 = vpack.c.bf16 %v23_v4, %v22_v3  ;;  %v286_v8 = vld [vmem:[%s400_s3 + $0x28] sm:$0xff]  }
   0x4   :  { %258 = vmatpush3.bf16.msra.mxu1 %v284_v5 }
   0x5   :  { %259 = vmatprep.subr.bf16.mxu1 %v314_v1 }
   0x6   :  { %252 = vmatpush3.bf16.msra.mxu0 %v283_v2 }
   0x8   :  { %260 = vmatpush3.bf16.msra.mxu1 %v285_v7 }
   0x9   :  { %254 = vmatmul.mubr.msk.bf16.vlgmr.msra.gmra.mxu0 %vm48_vm1, %v24_v6  ;;  %261 = vmatprep.subr.bf16.mxu1 %v314_v1 }
   0xa   :  { %10 = vsyncpa [#allocation3], 0  ;;  %v287_v9 = vld [vmem:[%s400_s3 + $0x20] sm:$0xff]   ;;  %v288_v10 = vld [vmem:[%s400_s3 + $0x18] sm:$0xff]  }
   0xb   :  { %v289_v11 = vld [vmem:[%s400_s3 + $0x10] sm:$0xff]   ;;  %v290_v12 = vld [vmem:[%s400_s3 + $0x8] sm:$0xff]   ;;  %v291_v13 = vld [vmem:[%s400_s3] sm:$0xff]   ;;  %s316_s3 = smov [#allocation2]  }
   0xc   :  { %262 = vmatpush3.bf16.msra.mxu1 %v286_v8  ;;  %v224_v15 = vld [vmem:[%s399_s2] ss:$0 sm:$0xff]  ;;  %s213_s19 = sshll.u32 %s316_s3, 4  ;;  %s214_s19 = int_to_ptr.vmem [resolvable:$true] %s213_s19 }
   0xd   :  { %263 = vmatprep.subr.bf16.mxu1 %v314_v1  ;;  %v228_v22 = vld [vmem:[%s401_s4] ss:$0 sm:$0xff]  ;;  %s292_s2 = scalar_lea.vmem %s214_s19, 256  ;;  %p297_p1 = scmp.lt.s32.totalorder %s214_s19, %s214_s19 }
   0xe   :  { %p293_p0 = scmp.ne.s32.totalorder %s214_s19, %s292_s2  ;;  %p298_p2 = scmp.lt.s32.totalorder %s292_s2, %s292_s2 }
  0x10   :  { %264 = vmatpush3.bf16.msra.mxu1 %v287_v9  ;;  %p299_p3 = por %p298_p2, %p297_p1 }
  0x11   :  { %265 = vmatprep.subr.bf16.mxu1 %v314_v1 }
  0x12   :  { %p300_p4 = pnand %p299_p3, %p293_p0 }
  0x14   :  { %266 = vmatpush3.bf16.msra.mxu1 %v288_v10 }
  0x15   :  { %267 = vmatprep.subr.bf16.mxu1 %v314_v1 }
  0x18   :  { %268 = vmatpush3.bf16.msra.mxu1 %v289_v11 }
  0x19   :  { %269 = vmatprep.subr.bf16.mxu1 %v314_v1 }
  0x1c   :  { %270 = vmatpush3.bf16.msra.mxu1 %v290_v12 }
  0x1d   :  { %271 = vmatprep.subr.bf16.mxu1 %v314_v1 }
  0x20   :  { %272 = vmatpush3.bf16.msra.mxu1 %v291_v13 }
  0xc9   :  { %v86_v14 = vpop.f32.mrf.mxu0 }
  0xca   :  { %v87_v18 = vadd.f32 %v224_v15, %v86_v14 }
  0xcb   :  { %v255_v16 = vpop.f32.mrf.mxu0 }
  0xcd   :  { %v89_v17 = vpop.f32.mrf.mxu0 }
  0xce   :  { %v90_v19 = vadd.f32 %v224_v15, %v89_v17 }
  0xcf   :  { %v256_v20 = vpop.f32.mrf.mxu0 }
  0xd0   :  { %v93_v21 = vpack.c.bf16 %v90_v19, %v87_v18 }
  0xd2   :  { %274 = vmatmul.mubr.bf16.vlgmr.msra.gmra.mxu1 %v93_v21 }
 0x192   :  { %v199_v23 = vpop.f32.mrf.mxu1 }
 0x193   :  { %v200_v24 = vadd.f32 %v228_v22, %v199_v23 }
 0x194   :  { %v275_v25 = vpop.f32.mrf.mxu1 }
 0x195   :  { %206 = vst.msk [vmem:[#allocation2] sm:$0xff] %vm48_vm1, %v200_v24 }
 0x196   :  { %v202_v26 = vpop.f32.mrf.mxu1 }
 0x197   :  { %v203_v27 = vadd.f32 %v228_v22, %v202_v26 }
 0x198   :  { %v276_v28 = vpop.f32.mrf.mxu1 }
 0x199   :  { %207 = vst.msk [vmem:[#allocation2 + $0x8] sm:$0xff] %vm48_vm1, %v203_v27 }
 0x19a   :  { %303 = shalt.err (!%p300_p4)
}
 0x19b   :  { %s317_s4 = smov 128   ;;  %s318_s20 = smov 8  }
 0x19c   :  { %219 = dma.vmem_to_hbm [thread:$0]  %s214_s19, 256, %s402_s5, [#allocation3], %s317_s4, %s317_s4, %s318_s20  }
 0x19d   :  { %312 = dma.done.wait [#allocation3], 256  }
 0x19e   :  { %313 = vsyncadd [#allocation3], 4294967040 }
 0x19f   :  { %223 = vsyncpa [#allocation3], 1 }

</bundles_post_ra>
